<compile_context>
chip_gen: v7x
topology: tpu7x:2x2x1
jax: 0.10.0
libtpu: 0.0.40
codegen_flags: <defaults>
</compile_context>

<pallas_src>
import jax
import jax.numpy as jnp
from jax.experimental import pallas as pl
from jax.experimental.pallas import tpu as pltpu


def gau_forward_kernel(u_ref, i_ref, ub_ref, ib_ref, o_ref):
    """Hot path on (D, tile_b) lane-dense tiles (batch on lanes).

    u_ref, i_ref   : (D, tile_b)  gathered user / item embeddings (bf16)
    ub_ref, ib_ref : (1, tile_b)  gathered user / item biases (f32)
    o_ref          : (1, tile_b)  output loss values (f32), lane-dense store
    """
    prod = u_ref[...].astype(jnp.float32) * i_ref[...].astype(jnp.float32)
    dot = jnp.sum(prod, axis=0, keepdims=True)        # (1, tile_b), reduce over D sublanes
    o_ref[...] = dot + ub_ref[...] + ib_ref[...]


def _round_up(x, m):
    return ((x + m - 1) // m) * m


def _pick_tile_b(B, D, itemsize):
    """Pick a lane-dense batch tile: multiple of 128, big enough to amortize the
    ~0.35 us per-grid-step overhead, small enough for VMEM on all generations."""
    b128 = _round_up(max(B, 1), 128)
    # VMEM budget: 2 embedding inputs x 2 pipeline buffers x (D, tile_b) x itemsize,
    # kept well under the 32 MiB default scoped-VMEM limit (safe for v7x's 64 MiB VMEM).
    vmem_cap = (16 * 1024 * 1024) // max(1, 2 * 2 * D * itemsize)
    vmem_cap = max(128, (vmem_cap // 128) * 128)
    tile_b = min(2048, vmem_cap, b128)
    # Prefer >= 2 grid steps so the "parallel" batch axis can shard across v7x's 2 TCs.
    if b128 > 128 and tile_b >= b128:
        tile_b = max(128, ((b128 // 2) // 128) * 128)
    return tile_b


def gau_forward(user_table, item_table, user_bias_table, item_bias_table,
                uids, iids, *, tile_b=None):
    """Equivalent of GAU.forward(uids, iids).

    The embedding-table gather is index plumbing and stays in plain JAX (XLA's fused
    gather); layout plumbing presents the gathered rows transposed so the kernel sees
    batch on lanes.  The multiply / reduce / bias-add hot path runs inside the Pallas
    kernel, tiled over the (padded) batch dimension.
    """
    B = uids.shape[0]
    D = user_table.shape[1]
    itemsize = user_table.dtype.itemsize

    if tile_b is None:
        tile_b = _pick_tile_b(B, D, itemsize)
    B_pad = pl.cdiv(B, tile_b) * tile_b
    pad = B_pad - B

    # Pad indices with 0 (always a valid row); padded outputs are sliced off below,
    # so no in-kernel tail masking is needed.
    uids_p = jnp.pad(uids, (0, pad))
    iids_p = jnp.pad(iids, (0, pad))

    # Gather stays in XLA; transpose is wrapper-side layout plumbing (batch -> lanes).
    # TODO(synk): fusing the gather into the kernel (scalar-prefetch ids + per-row
    # make_async_copy from HBM tables) would halve HBM traffic, but for small D it costs
    # 2*tile_b tiny (D*itemsize-byte) DMAs per step; left to XLA's fused gather here.
    u_t = jnp.take(user_table, uids_p, axis=0).T                    # (D, B_pad) bf16
    i_t = jnp.take(item_table, iids_p, axis=0).T                    # (D, B_pad) bf16
    ub = jnp.take(user_bias_table.reshape(-1), uids_p, axis=0)
    ib = jnp.take(item_bias_table.reshape(-1), iids_p, axis=0)
    ub = ub.astype(jnp.float32).reshape(1, B_pad)                   # (1, B_pad)
    ib = ib.astype(jnp.float32).reshape(1, B_pad)                   # (1, B_pad)

    grid = (B_pad // tile_b,)
    out = pl.pallas_call(
        gau_forward_kernel,
        out_shape=jax.ShapeDtypeStruct((1, B_pad), jnp.float32),
        grid_spec=pltpu.PrefetchScalarGridSpec(
            num_scalar_prefetch=0,
            grid=grid,
            in_specs=[
                pl.BlockSpec((D, tile_b), lambda b: (0, b)),
                pl.BlockSpec((D, tile_b), lambda b: (0, b)),
                pl.BlockSpec((1, tile_b), lambda b: (0, b)),
                pl.BlockSpec((1, tile_b), lambda b: (0, b)),
            ],
            out_specs=pl.BlockSpec((1, tile_b), lambda b: (0, b)),
        ),
        compiler_params=pltpu.CompilerParams(
            dimension_semantics=("parallel",)),
        cost_estimate=pl.CostEstimate(
            flops=2 * B_pad * D + 2 * B_pad,
            transcendentals=0,
            bytes_accessed=2 * B_pad * D * itemsize + 3 * B_pad * 4),
    )(u_t, i_t, ub, ib)
    return out[0, :B]                                               # (B,)


def init_params(key, n_users, n_items, embedding_dim):
    """Deterministic parameter init mirroring the module's __init__ shapes.

    ScaledEmbedding: normal(0, 1/embedding_dim), stored bf16 (streaming-bound kernel).
    ZeroEmbedding: nominally zeros; we use a tiny deterministic init so the bias-add
    path is actually exercised numerically.
    """
    k1, k2, k3, k4 = jax.random.split(key, 4)
    scale = 1.0 / embedding_dim
    user_emb = (jax.random.normal(k1, (n_users, embedding_dim), jnp.float32)
                * scale).astype(jnp.bfloat16)
    item_emb = (jax.random.normal(k2, (n_items, embedding_dim), jnp.float32)
                * scale).astype(jnp.bfloat16)
    user_bias = jax.random.normal(k3, (n_users, 1), jnp.float32) * 0.01
    item_bias = jax.random.normal(k4, (n_items, 1), jnp.float32) * 0.01
    # TODO(synk): user_additional / item_additional embeddings exist in __init__
    # but are not used by forward(); they are omitted from the kernel path.
    return user_emb, item_emb, user_bias, item_bias


if __name__ == "__main__":
    n_users, n_items, embedding_dim = 64, 48, 32
    batch = 16

    key = jax.random.PRNGKey(0)
    kp, ku, ki = jax.random.split(key, 3)
    user_emb, item_emb, user_bias, item_bias = init_params(
        kp, n_users, n_items, embedding_dim)

    uids = jax.random.randint(ku, (batch,), 0, n_users, dtype=jnp.int32)
    iids = jax.random.randint(ki, (batch,), 0, n_items, dtype=jnp.int32)

    loss = gau_forward(user_emb, item_emb, user_bias, item_bias, uids, iids)
    loss = jax.block_until_ready(loss)

    # Pure-JAX reference of the PyTorch forward semantics (f32 accumulation).
    u_ref = user_emb[uids].astype(jnp.float32)
    i_ref = item_emb[iids].astype(jnp.float32)
    ref = (u_ref * i_ref).sum(axis=1) + user_bias[uids][:, 0] + item_bias[iids][:, 0]

    assert loss.shape == (batch,)
    assert jnp.allclose(loss, ref, atol=1e-5, rtol=1e-4), (loss, ref)
    print("KERNEL_OK")
</pallas_src>

<mosaic_0001>
module attributes {stable_mosaic.version = 11 : i64} {
  func.func @gau_forward_kernel(%arg0: i32, %arg1: memref<32x128xbf16, #tpu.memory_space<vmem>>, %arg2: memref<32x128xbf16, #tpu.memory_space<vmem>>, %arg3: memref<1x128xf32, #tpu.memory_space<vmem>>, %arg4: memref<1x128xf32, #tpu.memory_space<vmem>>, %arg5: memref<1x128xf32, #tpu.memory_space<vmem>>) attributes {dimension_semantics = [#tpu.dimension_semantics<parallel>], iteration_bounds = array<i64: 1>, scalar_prefetch = 0 : i64, scratch_operands = 0 : i64, tpu.core_type = #tpu.core_type<tc>, window_params = [{transform_indices = @transform_0, window_bounds = array<i64: 32, 128>}, {transform_indices = @transform_1, window_bounds = array<i64: 32, 128>}, {transform_indices = @transform_2, window_bounds = array<i64: 1, 128>}, {transform_indices = @transform_3, window_bounds = array<i64: 1, 128>}, {transform_indices = @transform_4, window_bounds = array<i64: 1, 128>}]} {
    %c0 = arith.constant 0 : index
    %c0_0 = arith.constant 0 : index
    %0 = vector.load %arg1[%c0, %c0_0] : memref<32x128xbf16, #tpu.memory_space<vmem>>, vector<32x128xbf16>
    %1 = arith.extf %0 : vector<32x128xbf16> to vector<32x128xf32>
    %c0_1 = arith.constant 0 : index
    %c0_2 = arith.constant 0 : index
    %2 = vector.load %arg2[%c0_1, %c0_2] : memref<32x128xbf16, #tpu.memory_space<vmem>>, vector<32x128xbf16>
    %3 = arith.extf %2 : vector<32x128xbf16> to vector<32x128xf32>
    %4 = arith.mulf %1, %3 : vector<32x128xf32>
    %cst = arith.constant dense<0.000000e+00> : vector<128xf32>
    %5 = vector.multi_reduction <add>, %4, %cst [0] : vector<32x128xf32> to vector<128xf32>
    %6 = vector.shape_cast %5 : vector<128xf32> to vector<1x128xf32>
    %c0_3 = arith.constant 0 : index
    %c0_4 = arith.constant 0 : index
    %7 = vector.load %arg3[%c0_3, %c0_4] : memref<1x128xf32, #tpu.memory_space<vmem>>, vector<1x128xf32>
    %8 = arith.addf %6, %7 : vector<1x128xf32>
    %c0_5 = arith.constant 0 : index
    %c0_6 = arith.constant 0 : index
    %9 = vector.load %arg4[%c0_5, %c0_6] : memref<1x128xf32, #tpu.memory_space<vmem>>, vector<1x128xf32>
    %10 = arith.addf %8, %9 : vector<1x128xf32>
    %c0_7 = arith.constant 0 : index
    %c0_8 = arith.constant 0 : index
    %11 = vector.load %arg5[%c0_7, %c0_8] : memref<1x128xf32, #tpu.memory_space<vmem>>, vector<1x128xf32>
    tpu.vector_store %arg5[%c0_7, %c0_8], %10 {strides = array<i32>} : memref<1x128xf32, #tpu.memory_space<vmem>>, vector<1x128xf32>,
    return
  }
  func.func @transform_0(%arg0: i32) -> (i32, i32) {
    %c0_i32 = arith.constant 0 : i32
    %c0_i32_0 = arith.constant 0 : i32
    return %c0_i32, %arg0 : i32, i32
  }
  func.func @transform_1(%arg0: i32) -> (i32, i32) {
    %c0_i32 = arith.constant 0 : i32
    %c0_i32_0 = arith.constant 0 : i32
    return %c0_i32, %arg0 : i32, i32
  }
  func.func @transform_2(%arg0: i32) -> (i32, i32) {
    %c0_i32 = arith.constant 0 : i32
    %c0_i32_0 = arith.constant 0 : i32
    return %c0_i32, %arg0 : i32, i32
  }
  func.func @transform_3(%arg0: i32) -> (i32, i32) {
    %c0_i32 = arith.constant 0 : i32
    %c0_i32_0 = arith.constant 0 : i32
    return %c0_i32, %arg0 : i32, i32
  }
  func.func @transform_4(%arg0: i32) -> (i32, i32) {
    %c0_i32 = arith.constant 0 : i32
    %c0_i32_0 = arith.constant 0 : i32
    return %c0_i32, %arg0 : i32, i32
  }
}

</mosaic_0001>

<bundles_post_ra>
// kernel: tpu_custom_call.1
= control target key start
LH: loop header
LB: loop body
LE: loop exit
PB: predicated region body
PF: predicated region fallthrough
CT: control target
= control target key end

     0   :  { %9 = vsyncpa [#allocation3], 0  ;;  %s263_s0 = inlined_call_operand.hbm [shape: bf16[32,128], index: 0, kind: input, shape index: {}]   ;;  %s264_s1 = inlined_call_operand.hbm [shape: bf16[32,128], index: 1, kind: input, shape index: {}]   ;;  %s265_s2 = inlined_call_operand.vmem [shape: f32[1,128], index: 2, kind: input, shape index: {}]   ;;  %s266_s3 = inlined_call_operand.vmem [shape: f32[1,128], index: 3, kind: input, shape index: {}]   ;;  %s267_s4 = inlined_call_operand.hbm [shape: f32[1,128], index: 4, kind: output, shape index: {}]  }
   0x1   :  { %10 = vsyncpa [#allocation6], 0 }
   0x2   :  { %11 = vsyncpa [#allocation4], 0  ;;  %s191_s15 = smov [#allocation2]   ;;  %s119_s19 = scalar_lea.hbm %s263_s0, 256 }
   0x3   :  { %s17_s16 = sshll.u32 %s191_s15, 4  ;;  %p120_p0 = scmp.ne.s32.totalorder %s263_s0, %s119_s19  ;;  %s18_s16 = int_to_ptr.vmem [resolvable:$true] %s17_s16 }
   0x4   :  { %p123_p1 = scmp.lt.u32.totalorder %s119_s19, %s263_s0 }
   0x6   :  { %p125_p2 = pnand %p123_p1, %p120_p0 }
   0x8   :  { %128 = shalt.err (!%p125_p2)
}
   0x9   :  { %s129_s24 = scalar_lea.vmem %s18_s16, 256  ;;  %p134_p4 = scmp.lt.s32.totalorder %s18_s16, %s18_s16 }
   0xa   :  { %p130_p3 = scmp.ne.s32.totalorder %s18_s16, %s129_s24  ;;  %p135_p5 = scmp.lt.s32.totalorder %s129_s24, %s129_s24 }
   0xc   :  { %p136_p6 = por %p135_p5, %p134_p4 }
   0xe   :  { %p137_p7 = pnand %p136_p6, %p130_p3 }
  0x10   :  { %140 = shalt.err (!%p137_p7)
}
  0x11   :  { %s192_s25 = smov 64   ;;  %s193_s26 = smov 4  }
  0x12   :  { %23 = dma.hbm_to_vmem [thread:$0]  %s263_s0, 256, %s18_s16, [#allocation3], %s192_s25, %s192_s25, %s193_s26  }
  0x13   :  { %s194_s29 = smov [#allocation5]   ;;  %s141_s7 = scalar_lea.hbm %s264_s1, 256 }
  0x14   :  { %s29_s30 = sshll.u32 %s194_s29, 4  ;;  %p142_p8 = scmp.ne.s32.totalorder %s264_s1, %s141_s7  ;;  %s30_s30 = int_to_ptr.vmem [resolvable:$true] %s29_s30 }
  0x15   :  { %p145_p9 = scmp.lt.u32.totalorder %s141_s7, %s264_s1 }
  0x17   :  { %p147_p10 = pnand %p145_p9, %p142_p8 }
  0x19   :  { %150 = shalt.err (!%p147_p10)
}
  0x1a   :  { %s151_s12 = scalar_lea.vmem %s30_s30, 256  ;;  %p156_p12 = scmp.lt.s32.totalorder %s30_s30, %s30_s30 }
  0x1b   :  { %p152_p11 = scmp.ne.s32.totalorder %s30_s30, %s151_s12  ;;  %p157_p13 = scmp.lt.s32.totalorder %s151_s12, %s151_s12 }
  0x1d   :  { %p158_p0 = por %p157_p13, %p156_p12 }
  0x1f   :  { %p159_p1 = pnand %p158_p0, %p152_p11 }
  0x21   :  { %162 = shalt.err (!%p159_p1)
}
  0x22   :  { %35 = dma.hbm_to_vmem [thread:$0]  %s264_s1, 256, %s30_s30, [#allocation6], %s192_s25, %s192_s25, %s193_s26  }
  0x23   :  { %185 = dma.done.wait [#allocation3], 256  }
  0x24   :  { %186 = vsyncadd [#allocation3], 4294967040 }
  0x25   :  { %187 = dma.done.wait [#allocation6], 256  }
  0x26   :  { %188 = vsyncadd [#allocation6], 4294967040  ;;  %v97_v0 = vld [vmem:[#allocation2] sm:$0xff]   ;;  %v112_v1 = vld [vmem:[#allocation2 + $0x8] sm:$0xff]   ;;  %s195_s17 = smov [#allocation7]  }
  0x27   :  { %v105_v2 = vld [vmem:[#allocation5] sm:$0xff]   ;;  %v98_v3 = vunpack.c.l.bf16 %v97_v0  ;;  %v99_v4 = vunpack.c.h.bf16 %v97_v0  ;;  %v102_v5 = vunpack.c.l.bf16 %v112_v1  ;;  %v103_v6 = vunpack.c.h.bf16 %v112_v1  ;;  %v113_v7 = vld [vmem:[#allocation5 + $0x8] sm:$0xff]   ;;  %v75_v24 = vld [vmem:[%s265_s2] sm:$0x1]  ;;  %s86_s18 = sshll.u32 %s195_s17, 4  ;;  %s87_s18 = int_to_ptr.vmem [resolvable:$true] %s86_s18 }
  0x28   :  { %v106_v8 = vunpack.c.l.bf16 %v105_v2  ;;  %v107_v9 = vunpack.c.h.bf16 %v105_v2  ;;  %v110_v10 = vunpack.c.l.bf16 %v113_v7  ;;  %v111_v11 = vunpack.c.h.bf16 %v113_v7  ;;  %v77_v26 = vld [vmem:[%s266_s3] sm:$0x1]  ;;  %s163_s19 = scalar_lea.vmem %s87_s18, 16  ;;  %s167_s20 = scalar_lea.vmem %s87_s18, 32 }
  0x29   :  { %p164_p2 = scmp.ne.s32.totalorder %s87_s18, %s163_s19  ;;  %p168_p3 = scmp.lt.s32.totalorder %s87_s18, %s87_s18 }
  0x2a   :  { %v62_v12 = vmul.f32 %v106_v8, %v98_v3  ;;  %v63_v13 = vmul.f32 %v107_v9, %v99_v4  ;;  %v64_v14 = vmul.f32 %v110_v10, %v102_v5  ;;  %v65_v15 = vmul.f32 %v111_v11, %v103_v6  ;;  %p169_p4 = scmp.lt.s32.totalorder %s167_s20, %s163_s19 }
  0x2c   :  { %v66_v16 = vadd.f32 %v63_v13, %v62_v12  ;;  %p170_p5 = por %p169_p4, %p168_p3 }
  0x2e   :  { %v67_v17 = vadd.f32 %v66_v16, %v64_v14  ;;  %p171_p6 = pnand %p170_p5, %p164_p2 }
  0x30   :  { %v68_v18 = vadd.f32 %v67_v17, %v65_v15 }
  0x32   :  { %v69_v19 = vrot.slane %v68_v18, 4 }
  0x34   :  { %v70_v20 = vadd.f32 %v69_v19, %v68_v18 }
  0x36   :  { %v71_v21 = vrot.slane %v70_v20, 2 }
  0x38   :  { %v72_v22 = vadd.f32 %v71_v21, %v70_v20 }
  0x3a   :  { %v73_v23 = vrot.slane %v72_v22, 1 }
  0x3c   :  { %v74_v25 = vadd.f32 %v73_v23, %v72_v22 }
  0x3e   :  { %v76_v27 = vadd.f32 %v75_v24, %v74_v25 }
  0x40   :  { %v78_v28 = vadd.f32 %v77_v26, %v76_v27 }
  0x42   :  { %79 = vst [vmem:[#allocation7] sm:$0x1] %v78_v28 }
  0x43   :  { %174 = shalt.err (!%p171_p6)
}
  0x44   :  { %s175_s22 = scalar_lea.hbm %s267_s4, 16 }
  0x45   :  { %p176_p7 = scmp.ne.s32.totalorder %s267_s4, %s175_s22  ;;  %p179_p8 = scmp.lt.u32.totalorder %s175_s22, %s267_s4 }
  0x47   :  { %p181_p9 = pnand %p179_p8, %p176_p7 }
  0x49   :  { %184 = shalt.err (!%p181_p9)
}
  0x4a   :  { %89 = dma.vmem_to_hbm [thread:$0]  %s87_s18, 16, %s267_s4, [#allocation4]  }
  0x4b   :  { %189 = dma.done.wait [#allocation4], 16  }
  0x4c   :  { %190 = vsyncadd [#allocation4], 4294967280 }
  0x4d   :  { %93 = vsyncpa [#allocation3], 1 }
  0x4e   :  { %94 = vsyncpa [#allocation6], 1 }
  0x4f   :  { %95 = vsyncpa [#allocation4], 1 }

</bundles_post_ra>
